<compile_context>
chip_gen: v7x
topology: tpu7x:2x2x1
jax: 0.10.0
libtpu: 0.0.40
codegen_flags: <defaults>
</compile_context>

<pallas_src>
import math

import numpy as np
import jax
import jax.numpy as jnp
from jax.experimental import pallas as pl
from jax.experimental.pallas import tpu as pltpu

_RAD_400 = 400.0 * math.pi / 180.0   # 400 deg/s in rad/s
_LANES = 128


def _round_up(x, m):
    return ((x + m - 1) // m) * m


def _as_three_floats(x):
    arr = np.asarray(jax.device_get(jnp.asarray(x, jnp.float32))).reshape(3)
    return [float(v) for v in arr]


def _choose_row_tiling(rows, max_rows_per_tile=256, overhead_rows=48):
    """Pick rows-per-tile (multiple of 8) balancing padding vs. per-step overhead.

    rows is already a multiple of 8.  Requires >= 2 tiles when rows >= 16 so a
    two-TensorCore part (v7x) can split the 'parallel' grid axis.
    """
    best = None
    for rt in range(8, min(max_rows_per_tile, rows) + 1, 8):
        padded = _round_up(rows, rt)
        grid = padded // rt
        if rows >= 16 and grid < 2:
            continue
        score = padded + grid * overhead_rows
        if best is None or score < best[0] or (score == best[0] and rt > best[1]):
            best = (score, rt, padded, grid)
    if best is None:                      # rows == 8
        return 8, rows, 1
    _, rt, padded, grid = best
    return rt, padded, grid


def _make_kernel(dt, gain_p, gain_i, gain_d, gain_ff, lim_int, lim_out, slew_rate):
    """Build the Pallas kernel.  All controller buffers are baked as SCALAR
    Python constants (no captured arrays) and the 3 axes are unrolled."""
    kp = _as_three_floats(gain_p)
    ki_dt = [v * float(dt) for v in _as_three_floats(gain_i)]   # gain_i * dt folded
    kd = _as_three_floats(gain_d)
    kff = _as_three_floats(gain_ff)
    li = _as_three_floats(lim_int)
    lo = _as_three_floats(lim_out)
    slew = _as_three_floats(slew_rate)
    use_prev = any(math.isfinite(s) for s in slew)   # default config: all +inf -> False
    inv_rad2 = 1.0 / (_RAD_400 * _RAD_400)

    def body(rate_ref, sp_ref, acc_ref, int_ref, prev_ref, mask_ref,
             final_ref, newint_ref):
        mask = mask_ref[...]                                      # (rt, 128) int32
        not_landed = ((mask & 64) == 0).astype(jnp.float32)       # (rt, 128)

        for a in range(3):                                        # unrolled: scalar consts
            r = rate_ref[a]                                       # (rt, 128) f32
            sp = sp_ref[a]
            rint = int_ref[a]
            err = sp - r

            # ---- PID output path ----
            raw = err * kp[a] + rint
            if kd[a] != 0.0:
                raw = raw - acc_ref[a] * kd[a]
            if kff[a] != 0.0:
                raw = raw + sp * kff[a]
            clipped = jnp.clip(raw, -lo[a], lo[a])
            if prev_ref is not None and math.isfinite(slew[a]):
                prev = prev_ref[a]
                max_d = slew[a] * float(dt)
                final = prev + jnp.clip(clipped - prev, -max_d, max_d)
            else:
                # slew_rate == +inf  =>  slew limit is a no-op (default config)
                final = clipped
            final_ref[a] = final

            # ---- anti-windup integrator update ----
            sat_p = (mask & (1 << a)) != 0
            sat_n = (mask & (8 << a)) != 0
            err_i = jnp.where(sat_p & (err > 0.0), 0.0, err)
            err_i = jnp.where(sat_n & (err_i < 0.0), 0.0, err_i)
            i_factor = jnp.clip(1.0 - (err_i * err_i) * inv_rad2, 0.0, 1.0)
            d_int = (i_factor * err_i) * ki_dt[a] * not_landed
            newint_ref[a] = jnp.clip(rint + d_int, -li[a], li[a])

    if use_prev:
        def kernel(rate_ref, sp_ref, acc_ref, int_ref, prev_ref, mask_ref,
                   final_ref, newint_ref):
            body(rate_ref, sp_ref, acc_ref, int_ref, prev_ref, mask_ref,
                 final_ref, newint_ref)
    else:
        def kernel(rate_ref, sp_ref, acc_ref, int_ref, mask_ref,
                   final_ref, newint_ref):
            body(rate_ref, sp_ref, acc_ref, int_ref, None, mask_ref,
                 final_ref, newint_ref)
    return kernel, use_prev


class RateControllerPallas:
    """Pallas TPU port of RateController with persistent lane-major state."""

    def __init__(self, num_envs, dt, *,
                 gain_p=(0.15, 0.15, 0.2), gain_i=(0.2, 0.2, 0.1),
                 gain_d=(0.003, 0.003, 0.0), gain_ff=(0.0, 0.0, 0.0),
                 lim_int=(0.3, 0.3, 0.3), lim_out=(1.0, 1.0, 1.0),
                 slew_rate=(float("inf"),) * 3,
                 rows_per_tile=256):
        self.num_envs = int(num_envs)
        self.dt = float(dt)

        # ---- env layout: (rows, 128 lanes), rows a multiple of 8 (full sublanes)
        rows_raw = _round_up(self.num_envs, 8 * _LANES) // _LANES
        rt, rows, grid = _choose_row_tiling(rows_raw, max_rows_per_tile=rows_per_tile)
        self._rows = rows
        self._rt = rt
        self._grid = grid
        self.n_pad = rows * _LANES

        kernel, use_prev = _make_kernel(self.dt, gain_p, gain_i, gain_d, gain_ff,
                                        lim_int, lim_out, slew_rate)
        self._use_prev = use_prev

        vec_spec = pl.BlockSpec((3, rt, _LANES), lambda i: (0, i, 0))
        msk_spec = pl.BlockSpec((rt, _LANES), lambda i: (i, 0))

        in_specs = [vec_spec, vec_spec, vec_spec, vec_spec]
        if use_prev:
            in_specs.append(vec_spec)
        in_specs.append(msk_spec)

        # Alias rate_int -> new_rate_int (and prev_output -> final_output when
        # the slew path is active).  With a donating caller this is a true
        # in-place state update (PyTorch .copy_() semantics).
        aliases = {3: 1, 4: 0} if use_prev else {3: 1}

        call = pl.pallas_call(
            kernel,
            grid=(grid,),
            in_specs=in_specs,
            out_specs=[vec_spec, vec_spec],
            out_shape=(jax.ShapeDtypeStruct((3, rows, _LANES), jnp.float32),
                       jax.ShapeDtypeStruct((3, rows, _LANES), jnp.float32)),
            input_output_aliases=aliases,
            compiler_params=pltpu.CompilerParams(
                dimension_semantics=("parallel",)),
        )
        self._step = jax.jit(call)

        # Persistent lane-major state (never transposed between steps).
        self.rate_int = jnp.zeros((3, rows, _LANES), jnp.float32)
        self.prev_output = jnp.zeros((3, rows, _LANES), jnp.float32)

    # ---------- layout helpers (compat path only) ----------
    def _pack_vec(self, x):
        x = jnp.asarray(x, jnp.float32).T                              # (3, n)
        x = jnp.pad(x, ((0, 0), (0, self.n_pad - self.num_envs)))
        return x.reshape(3, self._rows, _LANES)

    def _unpack_vec(self, x):
        return x.reshape(3, self.n_pad)[:, :self.num_envs].T           # (n, 3)

    def _pack_mask(self, landed, sat_pos, sat_neg):
        n = self.num_envs
        if sat_pos is None:
            sat_pos = jnp.zeros((n, 3), bool)
        if sat_neg is None:
            sat_neg = jnp.zeros((n, 3), bool)
        sp = jnp.asarray(sat_pos).astype(jnp.int32)
        sn = jnp.asarray(sat_neg).astype(jnp.int32)
        ld = jnp.broadcast_to(jnp.asarray(landed, dtype=bool), (n,)).astype(jnp.int32)
        m = (sp[:, 0] | (sp[:, 1] << 1) | (sp[:, 2] << 2)
             | (sn[:, 0] << 3) | (sn[:, 1] << 4) | (sn[:, 2] << 5)
             | (ld << 6))
        m = jnp.pad(m, (0, self.n_pad - n))
        return m.reshape(self._rows, _LANES)

    # ---------- fast path: everything already lane-major ----------
    def step_lane_major(self, rate_lm, rate_sp_lm, accel_lm, mask_lm):
        args = [rate_lm, rate_sp_lm, accel_lm, self.rate_int]
        if self._use_prev:
            args.append(self.prev_output)
        args.append(mask_lm)
        final, new_int = self._step(*args)
        self.rate_int = new_int          # module's rate_int.copy_(new_rate_int)
        self.prev_output = final         # module's prev_output.copy_(final_output)
        return final

    # ---------- PyTorch-layout compat path ----------
    def forward(self, rate, rate_sp, angular_accel, landed=False,
                saturation_positive=None, saturation_negative=None):
        final = self.step_lane_major(
            self._pack_vec(rate), self._pack_vec(rate_sp),
            self._pack_vec(angular_accel),
            self._pack_mask(landed, saturation_positive, saturation_negative))
        return self._unpack_vec(final)

    __call__ = forward

    def get_rate_int(self):
        return self._unpack_vec(self.rate_int)

    def get_prev_output(self):
        return self._unpack_vec(self.prev_output)

    def reset(self, env_ids=None):
        # TODO(synk): reset(env_ids) is a trivial JAX scatter outside the kernel.
        if env_ids is None:
            self.rate_int = jnp.zeros_like(self.rate_int)
            self.prev_output = jnp.zeros_like(self.prev_output)
        else:
            ids = jnp.asarray(env_ids, jnp.int32)
            ri = self.rate_int.reshape(3, self.n_pad).at[:, ids].set(0.0)
            po = self.prev_output.reshape(3, self.n_pad).at[:, ids].set(0.0)
            self.rate_int = ri.reshape(3, self._rows, _LANES)
            self.prev_output = po.reshape(3, self._rows, _LANES)


def _reference_forward(rate, rate_sp, angular_accel, rate_int, prev_output,
                       landed, sat_pos, sat_neg,
                       gain_p, gain_i, gain_d, gain_ff,
                       lim_int, lim_out, slew_rate, dt):
    rate_error = rate_sp - rate
    raw = gain_p * rate_error + rate_int - gain_d * angular_accel + gain_ff * rate_sp
    clipped = jnp.clip(raw, -lim_out, lim_out)
    max_delta = slew_rate * dt
    limited = jnp.clip(clipped - prev_output, -max_delta, max_delta)
    final = prev_output + limited
    err_i = jnp.where(sat_pos & (rate_error > 0), 0.0, rate_error)
    err_i = jnp.where(sat_neg & (err_i < 0), 0.0, err_i)
    i_factor = jnp.clip(1.0 - (err_i / _RAD_400) ** 2, 0.0, 1.0)
    delta_int = i_factor * (gain_i * err_i) * dt
    delta_int = delta_int * (~landed).astype(jnp.float32)[:, None]
    new_int = jnp.clip(rate_int + delta_int, -lim_int, lim_int)
    return final, new_int


if __name__ == "__main__":
    num_envs = 8
    dt = 0.01

    ctrl = RateControllerPallas(num_envs, dt)   # defaults == RateController buffers

    key = jax.random.PRNGKey(0)
    k1, k2, k3, k4, k5, k6 = jax.random.split(key, 6)
    rate = jax.random.normal(k1, (num_envs, 3), jnp.float32)
    rate_sp = jax.random.normal(k2, (num_envs, 3), jnp.float32)
    angular_accel = jax.random.normal(k3, (num_envs, 3), jnp.float32)
    landed = jax.random.bernoulli(k4, 0.25, (num_envs,))
    saturation_positive = jax.random.bernoulli(k5, 0.25, (num_envs, 3))
    saturation_negative = jax.random.bernoulli(k6, 0.25, (num_envs, 3))

    final_out = ctrl.forward(rate, rate_sp, angular_accel, landed,
                             saturation_positive, saturation_negative)
    new_rate_int = ctrl.get_rate_int()
    jax.block_until_ready((final_out, new_rate_int))

    # ---- pure-JAX reference (initial state = zeros, as in the fresh module) ----
    gain_p = jnp.array([0.15, 0.15, 0.2], jnp.float32)
    gain_i = jnp.array([0.2, 0.2, 0.1], jnp.float32)
    gain_d = jnp.array([0.003, 0.003, 0.0], jnp.float32)
    gain_ff = jnp.array([0.0, 0.0, 0.0], jnp.float32)
    lim_int = jnp.array([0.3, 0.3, 0.3], jnp.float32)
    lim_out = jnp.array([1.0, 1.0, 1.0], jnp.float32)
    slew_rate = jnp.full((3,), jnp.inf, jnp.float32)
    zeros = jnp.zeros((num_envs, 3), jnp.float32)

    ref_final, ref_int = _reference_forward(
        rate, rate_sp, angular_accel, zeros, zeros,
        landed, saturation_positive, saturation_negative,
        gain_p, gain_i, gain_d, gain_ff, lim_int, lim_out, slew_rate, dt)

    assert jnp.allclose(final_out, ref_final, atol=1e-5, rtol=1e-5), "final_output mismatch"
    assert jnp.allclose(new_rate_int, ref_int, atol=1e-6, rtol=1e-5), "rate_int mismatch"

    print("KERNEL_OK")
</pallas_src>

<mosaic_0001>
module attributes {stable_mosaic.version = 11 : i64} {
  func.func @kernel(%arg0: i32, %arg1: memref<3x8x128xf32, #tpu.memory_space<vmem>>, %arg2: memref<3x8x128xf32, #tpu.memory_space<vmem>>, %arg3: memref<3x8x128xf32, #tpu.memory_space<vmem>>, %arg4: memref<3x8x128xf32, #tpu.memory_space<vmem>>, %arg5: memref<8x128xi32, #tpu.memory_space<vmem>>, %arg6: memref<3x8x128xf32, #tpu.memory_space<vmem>>, %arg7: memref<3x8x128xf32, #tpu.memory_space<vmem>>) attributes {dimension_semantics = [#tpu.dimension_semantics<parallel>], iteration_bounds = array<i64: 1>, scalar_prefetch = 0 : i64, scratch_operands = 0 : i64, tpu.core_type = #tpu.core_type<tc>, window_params = [{transform_indices = @transform_0, window_bounds = array<i64: 3, 8, 128>}, {transform_indices = @transform_1, window_bounds = array<i64: 3, 8, 128>}, {transform_indices = @transform_2, window_bounds = array<i64: 3, 8, 128>}, {transform_indices = @transform_3, window_bounds = array<i64: 3, 8, 128>}, {transform_indices = @transform_4, window_bounds = array<i64: 8, 128>}, {transform_indices = @transform_5, window_bounds = array<i64: 3, 8, 128>}, {transform_indices = @transform_6, window_bounds = array<i64: 3, 8, 128>}]} {
    %c0 = arith.constant 0 : index
    %c0_0 = arith.constant 0 : index
    %0 = vector.load %arg5[%c0, %c0_0] : memref<8x128xi32, #tpu.memory_space<vmem>>, vector<8x128xi32>
    %c64_i32 = arith.constant 64 : i32
    %1 = vector.broadcast %c64_i32 : i32 to vector<8x128xi32>
    %2 = arith.andi %0, %1 : vector<8x128xi32>
    %c0_i32 = arith.constant 0 : i32
    %3 = vector.broadcast %c0_i32 : i32 to vector<8x128xi32>
    %4 = arith.cmpi eq, %2, %3 : vector<8x128xi32>
    %5 = arith.extui %4 : vector<8x128xi1> to vector<8x128xi32>
    %6 = arith.sitofp %5 : vector<8x128xi32> to vector<8x128xf32>
    %c0_1 = arith.constant 0 : index
    %c0_2 = arith.constant 0 : index
    %c0_3 = arith.constant 0 : index
    %7 = vector.load %arg1[%c0_1, %c0_2, %c0_3] : memref<3x8x128xf32, #tpu.memory_space<vmem>>, vector<1x8x128xf32>
    %8 = vector.shape_cast %7 : vector<1x8x128xf32> to vector<8x128xf32>
    %c0_4 = arith.constant 0 : index
    %c0_5 = arith.constant 0 : index
    %c0_6 = arith.constant 0 : index
    %9 = vector.load %arg2[%c0_4, %c0_5, %c0_6] : memref<3x8x128xf32, #tpu.memory_space<vmem>>, vector<1x8x128xf32>
    %10 = vector.shape_cast %9 : vector<1x8x128xf32> to vector<8x128xf32>
    %c0_7 = arith.constant 0 : index
    %c0_8 = arith.constant 0 : index
    %c0_9 = arith.constant 0 : index
    %11 = vector.load %arg4[%c0_7, %c0_8, %c0_9] : memref<3x8x128xf32, #tpu.memory_space<vmem>>, vector<1x8x128xf32>
    %12 = vector.shape_cast %11 : vector<1x8x128xf32> to vector<8x128xf32>
    %13 = arith.subf %10, %8 : vector<8x128xf32>
    %cst = arith.constant 1.500000e-01 : f32
    %14 = vector.broadcast %cst : f32 to vector<8x128xf32>
    %15 = arith.mulf %13, %14 : vector<8x128xf32>
    %16 = arith.addf %15, %12 : vector<8x128xf32>
    %c0_10 = arith.constant 0 : index
    %c0_11 = arith.constant 0 : index
    %c0_12 = arith.constant 0 : index
    %17 = vector.load %arg3[%c0_10, %c0_11, %c0_12] : memref<3x8x128xf32, #tpu.memory_space<vmem>>, vector<1x8x128xf32>
    %18 = vector.shape_cast %17 : vector<1x8x128xf32> to vector<8x128xf32>
    %cst_13 = arith.constant 3.000000e-03 : f32
    %19 = vector.broadcast %cst_13 : f32 to vector<8x128xf32>
    %20 = arith.mulf %18, %19 : vector<8x128xf32>
    %21 = arith.subf %16, %20 : vector<8x128xf32>
    %cst_14 = arith.constant -1.000000e+00 : f32
    %cst_15 = arith.constant 1.000000e+00 : f32
    %22 = vector.broadcast %cst_14 : f32 to vector<8x128xf32>
    %23 = arith.maximumf %22, %21 : vector<8x128xf32>
    %24 = vector.broadcast %cst_15 : f32 to vector<8x128xf32>
    %25 = arith.minimumf %24, %23 : vector<8x128xf32>
    %c0_16 = arith.constant 0 : index
    %c0_17 = arith.constant 0 : index
    %c0_18 = arith.constant 0 : index
    %26 = vector.load %arg6[%c0_16, %c0_17, %c0_18] : memref<3x8x128xf32, #tpu.memory_space<vmem>>, vector<1x8x128xf32>
    %27 = vector.shape_cast %26 : vector<1x8x128xf32> to vector<8x128xf32>
    %28 = vector.shape_cast %25 : vector<8x128xf32> to vector<1x8x128xf32>
    tpu.vector_store %arg6[%c0_16, %c0_17, %c0_18], %28 {strides = array<i32>} : memref<3x8x128xf32, #tpu.memory_space<vmem>>, vector<1x8x128xf32>,
    %c1_i32 = arith.constant 1 : i32
    %29 = vector.broadcast %c1_i32 : i32 to vector<8x128xi32>
    %30 = arith.andi %0, %29 : vector<8x128xi32>
    %c0_i32_19 = arith.constant 0 : i32
    %31 = vector.broadcast %c0_i32_19 : i32 to vector<8x128xi32>
    %32 = arith.cmpi ne, %30, %31 : vector<8x128xi32>
    %c8_i32 = arith.constant 8 : i32
    %33 = vector.broadcast %c8_i32 : i32 to vector<8x128xi32>
    %34 = arith.andi %0, %33 : vector<8x128xi32>
    %c0_i32_20 = arith.constant 0 : i32
    %35 = vector.broadcast %c0_i32_20 : i32 to vector<8x128xi32>
    %36 = arith.cmpi ne, %34, %35 : vector<8x128xi32>
    %cst_21 = arith.constant 0.000000e+00 : f32
    %37 = vector.broadcast %cst_21 : f32 to vector<8x128xf32>
    %38 = arith.cmpf ogt, %13, %37 : vector<8x128xf32>
    %39 = arith.andi %32, %38 : vector<8x128xi1>
    %cst_22 = arith.constant 0.000000e+00 : f32
    %40 = vector.broadcast %cst_22 : f32 to vector<8x128xf32>
    %41 = arith.select %39, %40, %13 : vector<8x128xi1>, vector<8x128xf32>
    %cst_23 = arith.constant 0.000000e+00 : f32
    %42 = vector.broadcast %cst_23 : f32 to vector<8x128xf32>
    %43 = arith.cmpf olt, %41, %42 : vector<8x128xf32>
    %44 = arith.andi %36, %43 : vector<8x128xi1>
    %cst_24 = arith.constant 0.000000e+00 : f32
    %45 = vector.broadcast %cst_24 : f32 to vector<8x128xf32>
    %46 = arith.select %44, %45, %41 : vector<8x128xi1>, vector<8x128xf32>
    %47 = arith.mulf %46, %46 : vector<8x128xf32>
    %cst_25 = arith.constant 0.0205175392 : f32
    %48 = vector.broadcast %cst_25 : f32 to vector<8x128xf32>
    %49 = arith.mulf %47, %48 : vector<8x128xf32>
    %cst_26 = arith.constant 1.000000e+00 : f32
    %50 = vector.broadcast %cst_26 : f32 to vector<8x128xf32>
    %51 = arith.subf %50, %49 : vector<8x128xf32>
    %cst_27 = arith.constant 0.000000e+00 : f32
    %cst_28 = arith.constant 1.000000e+00 : f32
    %52 = vector.broadcast %cst_27 : f32 to vector<8x128xf32>
    %53 = arith.maximumf %52, %51 : vector<8x128xf32>
    %54 = vector.broadcast %cst_28 : f32 to vector<8x128xf32>
    %55 = arith.minimumf %54, %53 : vector<8x128xf32>
    %56 = arith.mulf %55, %46 : vector<8x128xf32>
    %cst_29 = arith.constant 2.000000e-03 : f32
    %57 = vector.broadcast %cst_29 : f32 to vector<8x128xf32>
    %58 = arith.mulf %56, %57 : vector<8x128xf32>
    %59 = arith.mulf %58, %6 : vector<8x128xf32>
    %60 = arith.addf %12, %59 : vector<8x128xf32>
    %cst_30 = arith.constant -3.000000e-01 : f32
    %cst_31 = arith.constant 3.000000e-01 : f32
    %61 = vector.broadcast %cst_30 : f32 to vector<8x128xf32>
    %62 = arith.maximumf %61, %60 : vector<8x128xf32>
    %63 = vector.broadcast %cst_31 : f32 to vector<8x128xf32>
    %64 = arith.minimumf %63, %62 : vector<8x128xf32>
    %c0_32 = arith.constant 0 : index
    %c0_33 = arith.constant 0 : index
    %c0_34 = arith.constant 0 : index
    %65 = vector.load %arg7[%c0_32, %c0_33, %c0_34] : memref<3x8x128xf32, #tpu.memory_space<vmem>>, vector<1x8x128xf32>
    %66 = vector.shape_cast %65 : vector<1x8x128xf32> to vector<8x128xf32>
    %67 = vector.shape_cast %64 : vector<8x128xf32> to vector<1x8x128xf32>
    tpu.vector_store %arg7[%c0_32, %c0_33, %c0_34], %67 {strides = array<i32>} : memref<3x8x128xf32, #tpu.memory_space<vmem>>, vector<1x8x128xf32>,
    %c1 = arith.constant 1 : index
    %c0_35 = arith.constant 0 : index
    %c0_36 = arith.constant 0 : index
    %68 = vector.load %arg1[%c1, %c0_35, %c0_36] : memref<3x8x128xf32, #tpu.memory_space<vmem>>, vector<1x8x128xf32>
    %69 = vector.shape_cast %68 : vector<1x8x128xf32> to vector<8x128xf32>
    %c1_37 = arith.constant 1 : index
    %c0_38 = arith.constant 0 : index
    %c0_39 = arith.constant 0 : index
    %70 = vector.load %arg2[%c1_37, %c0_38, %c0_39] : memref<3x8x128xf32, #tpu.memory_space<vmem>>, vector<1x8x128xf32>
    %71 = vector.shape_cast %70 : vector<1x8x128xf32> to vector<8x128xf32>
    %c1_40 = arith.constant 1 : index
    %c0_41 = arith.constant 0 : index
    %c0_42 = arith.constant 0 : index
    %72 = vector.load %arg4[%c1_40, %c0_41, %c0_42] : memref<3x8x128xf32, #tpu.memory_space<vmem>>, vector<1x8x128xf32>
    %73 = vector.shape_cast %72 : vector<1x8x128xf32> to vector<8x128xf32>
    %74 = arith.subf %71, %69 : vector<8x128xf32>
    %cst_43 = arith.constant 1.500000e-01 : f32
    %75 = vector.broadcast %cst_43 : f32 to vector<8x128xf32>
    %76 = arith.mulf %74, %75 : vector<8x128xf32>
    %77 = arith.addf %76, %73 : vector<8x128xf32>
    %c1_44 = arith.constant 1 : index
    %c0_45 = arith.constant 0 : index
    %c0_46 = arith.constant 0 : index
    %78 = vector.load %arg3[%c1_44, %c0_45, %c0_46] : memref<3x8x128xf32, #tpu.memory_space<vmem>>, vector<1x8x128xf32>
    %79 = vector.shape_cast %78 : vector<1x8x128xf32> to vector<8x128xf32>
    %cst_47 = arith.constant 3.000000e-03 : f32
    %80 = vector.broadcast %cst_47 : f32 to vector<8x128xf32>
    %81 = arith.mulf %79, %80 : vector<8x128xf32>
    %82 = arith.subf %77, %81 : vector<8x128xf32>
    %cst_48 = arith.constant -1.000000e+00 : f32
    %cst_49 = arith.constant 1.000000e+00 : f32
    %83 = vector.broadcast %cst_48 : f32 to vector<8x128xf32>
    %84 = arith.maximumf %83, %82 : vector<8x128xf32>
    %85 = vector.broadcast %cst_49 : f32 to vector<8x128xf32>
    %86 = arith.minimumf %85, %84 : vector<8x128xf32>
    %c1_50 = arith.constant 1 : index
    %c0_51 = arith.constant 0 : index
    %c0_52 = arith.constant 0 : index
    %87 = vector.load %arg6[%c1_50, %c0_51, %c0_52] : memref<3x8x128xf32, #tpu.memory_space<vmem>>, vector<1x8x128xf32>
    %88 = vector.shape_cast %87 : vector<1x8x128xf32> to vector<8x128xf32>
    %89 = vector.shape_cast %86 : vector<8x128xf32> to vector<1x8x128xf32>
    tpu.vector_store %arg6[%c1_50, %c0_51, %c0_52], %89 {strides = array<i32>} : memref<3x8x128xf32, #tpu.memory_space<vmem>>, vector<1x8x128xf32>,
    %c2_i32 = arith.constant 2 : i32
    %90 = vector.broadcast %c2_i32 : i32 to vector<8x128xi32>
    %91 = arith.andi %0, %90 : vector<8x128xi32>
    %c0_i32_53 = arith.constant 0 : i32
    %92 = vector.broadcast %c0_i32_53 : i32 to vector<8x128xi32>
    %93 = arith.cmpi ne, %91, %92 : vector<8x128xi32>
    %c16_i32 = arith.constant 16 : i32
    %94 = vector.broadcast %c16_i32 : i32 to vector<8x128xi32>
    %95 = arith.andi %0, %94 : vector<8x128xi32>
    %c0_i32_54 = arith.constant 0 : i32
    %96 = vector.broadcast %c0_i32_54 : i32 to vector<8x128xi32>
    %97 = arith.cmpi ne, %95, %96 : vector<8x128xi32>
    %cst_55 = arith.constant 0.000000e+00 : f32
    %98 = vector.broadcast %cst_55 : f32 to vector<8x128xf32>
    %99 = arith.cmpf ogt, %74, %98 : vector<8x128xf32>
    %100 = arith.andi %93, %99 : vector<8x128xi1>
    %cst_56 = arith.constant 0.000000e+00 : f32
    %101 = vector.broadcast %cst_56 : f32 to vector<8x128xf32>
    %102 = arith.select %100, %101, %74 : vector<8x128xi1>, vector<8x128xf32>
    %cst_57 = arith.constant 0.000000e+00 : f32
    %103 = vector.broadcast %cst_57 : f32 to vector<8x128xf32>
    %104 = arith.cmpf olt, %102, %103 : vector<8x128xf32>
    %105 = arith.andi %97, %104 : vector<8x128xi1>
    %cst_58 = arith.constant 0.000000e+00 : f32
    %106 = vector.broadcast %cst_58 : f32 to vector<8x128xf32>
    %107 = arith.select %105, %106, %102 : vector<8x128xi1>, vector<8x128xf32>
    %108 = arith.mulf %107, %107 : vector<8x128xf32>
    %cst_59 = arith.constant 0.0205175392 : f32
    %109 = vector.broadcast %cst_59 : f32 to vector<8x128xf32>
    %110 = arith.mulf %108, %109 : vector<8x128xf32>
    %cst_60 = arith.constant 1.000000e+00 : f32
    %111 = vector.broadcast %cst_60 : f32 to vector<8x128xf32>
    %112 = arith.subf %111, %110 : vector<8x128xf32>
    %cst_61 = arith.constant 0.000000e+00 : f32
    %cst_62 = arith.constant 1.000000e+00 : f32
    %113 = vector.broadcast %cst_61 : f32 to vector<8x128xf32>
    %114 = arith.maximumf %113, %112 : vector<8x128xf32>
    %115 = vector.broadcast %cst_62 : f32 to vector<8x128xf32>
    %116 = arith.minimumf %115, %114 : vector<8x128xf32>
    %117 = arith.mulf %116, %107 : vector<8x128xf32>
    %cst_63 = arith.constant 2.000000e-03 : f32
    %118 = vector.broadcast %cst_63 : f32 to vector<8x128xf32>
    %119 = arith.mulf %117, %118 : vector<8x128xf32>
    %120 = arith.mulf %119, %6 : vector<8x128xf32>
    %121 = arith.addf %73, %120 : vector<8x128xf32>
    %cst_64 = arith.constant -3.000000e-01 : f32
    %cst_65 = arith.constant 3.000000e-01 : f32
    %122 = vector.broadcast %cst_64 : f32 to vector<8x128xf32>
    %123 = arith.maximumf %122, %121 : vector<8x128xf32>
    %124 = vector.broadcast %cst_65 : f32 to vector<8x128xf32>
    %125 = arith.minimumf %124, %123 : vector<8x128xf32>
    %c1_66 = arith.constant 1 : index
    %c0_67 = arith.constant 0 : index
    %c0_68 = arith.constant 0 : index
    %126 = vector.load %arg7[%c1_66, %c0_67, %c0_68] : memref<3x8x128xf32, #tpu.memory_space<vmem>>, vector<1x8x128xf32>
    %127 = vector.shape_cast %126 : vector<1x8x128xf32> to vector<8x128xf32>
    %128 = vector.shape_cast %125 : vector<8x128xf32> to vector<1x8x128xf32>
    tpu.vector_store %arg7[%c1_66, %c0_67, %c0_68], %128 {strides = array<i32>} : memref<3x8x128xf32, #tpu.memory_space<vmem>>, vector<1x8x128xf32>,
    %c2 = arith.constant 2 : index
    %c0_69 = arith.constant 0 : index
    %c0_70 = arith.constant 0 : index
    %129 = vector.load %arg1[%c2, %c0_69, %c0_70] : memref<3x8x128xf32, #tpu.memory_space<vmem>>, vector<1x8x128xf32>
    %130 = vector.shape_cast %129 : vector<1x8x128xf32> to vector<8x128xf32>
    %c2_71 = arith.constant 2 : index
    %c0_72 = arith.constant 0 : index
    %c0_73 = arith.constant 0 : index
    %131 = vector.load %arg2[%c2_71, %c0_72, %c0_73] : memref<3x8x128xf32, #tpu.memory_space<vmem>>, vector<1x8x128xf32>
    %132 = vector.shape_cast %131 : vector<1x8x128xf32> to vector<8x128xf32>
    %c2_74 = arith.constant 2 : index
    %c0_75 = arith.constant 0 : index
    %c0_76 = arith.constant 0 : index
    %133 = vector.load %arg4[%c2_74, %c0_75, %c0_76] : memref<3x8x128xf32, #tpu.memory_space<vmem>>, vector<1x8x128xf32>
    %134 = vector.shape_cast %133 : vector<1x8x128xf32> to vector<8x128xf32>
    %135 = arith.subf %132, %130 : vector<8x128xf32>
    %cst_77 = arith.constant 2.000000e-01 : f32
    %136 = vector.broadcast %cst_77 : f32 to vector<8x128xf32>
    %137 = arith.mulf %135, %136 : vector<8x128xf32>
    %138 = arith.addf %137, %134 : vector<8x128xf32>
    %cst_78 = arith.constant -1.000000e+00 : f32
    %cst_79 = arith.constant 1.000000e+00 : f32
    %139 = vector.broadcast %cst_78 : f32 to vector<8x128xf32>
    %140 = arith.maximumf %139, %138 : vector<8x128xf32>
    %141 = vector.broadcast %cst_79 : f32 to vector<8x128xf32>
    %142 = arith.minimumf %141, %140 : vector<8x128xf32>
    %c2_80 = arith.constant 2 : index
    %c0_81 = arith.constant 0 : index
    %c0_82 = arith.constant 0 : index
    %143 = vector.load %arg6[%c2_80, %c0_81, %c0_82] : memref<3x8x128xf32, #tpu.memory_space<vmem>>, vector<1x8x128xf32>
    %144 = vector.shape_cast %143 : vector<1x8x128xf32> to vector<8x128xf32>
    %145 = vector.shape_cast %142 : vector<8x128xf32> to vector<1x8x128xf32>
    tpu.vector_store %arg6[%c2_80, %c0_81, %c0_82], %145 {strides = array<i32>} : memref<3x8x128xf32, #tpu.memory_space<vmem>>, vector<1x8x128xf32>,
    %c4_i32 = arith.constant 4 : i32
    %146 = vector.broadcast %c4_i32 : i32 to vector<8x128xi32>
    %147 = arith.andi %0, %146 : vector<8x128xi32>
    %c0_i32_83 = arith.constant 0 : i32
    %148 = vector.broadcast %c0_i32_83 : i32 to vector<8x128xi32>
    %149 = arith.cmpi ne, %147, %148 : vector<8x128xi32>
    %c32_i32 = arith.constant 32 : i32
    %150 = vector.broadcast %c32_i32 : i32 to vector<8x128xi32>
    %151 = arith.andi %0, %150 : vector<8x128xi32>
    %c0_i32_84 = arith.constant 0 : i32
    %152 = vector.broadcast %c0_i32_84 : i32 to vector<8x128xi32>
    %153 = arith.cmpi ne, %151, %152 : vector<8x128xi32>
    %cst_85 = arith.constant 0.000000e+00 : f32
    %154 = vector.broadcast %cst_85 : f32 to vector<8x128xf32>
    %155 = arith.cmpf ogt, %135, %154 : vector<8x128xf32>
    %156 = arith.andi %149, %155 : vector<8x128xi1>
    %cst_86 = arith.constant 0.000000e+00 : f32
    %157 = vector.broadcast %cst_86 : f32 to vector<8x128xf32>
    %158 = arith.select %156, %157, %135 : vector<8x128xi1>, vector<8x128xf32>
    %cst_87 = arith.constant 0.000000e+00 : f32
    %159 = vector.broadcast %cst_87 : f32 to vector<8x128xf32>
    %160 = arith.cmpf olt, %158, %159 : vector<8x128xf32>
    %161 = arith.andi %153, %160 : vector<8x128xi1>
    %cst_88 = arith.constant 0.000000e+00 : f32
    %162 = vector.broadcast %cst_88 : f32 to vector<8x128xf32>
    %163 = arith.select %161, %162, %158 : vector<8x128xi1>, vector<8x128xf32>
    %164 = arith.mulf %163, %163 : vector<8x128xf32>
    %cst_89 = arith.constant 0.0205175392 : f32
    %165 = vector.broadcast %cst_89 : f32 to vector<8x128xf32>
    %166 = arith.mulf %164, %165 : vector<8x128xf32>
    %cst_90 = arith.constant 1.000000e+00 : f32
    %167 = vector.broadcast %cst_90 : f32 to vector<8x128xf32>
    %168 = arith.subf %167, %166 : vector<8x128xf32>
    %cst_91 = arith.constant 0.000000e+00 : f32
    %cst_92 = arith.constant 1.000000e+00 : f32
    %169 = vector.broadcast %cst_91 : f32 to vector<8x128xf32>
    %170 = arith.maximumf %169, %168 : vector<8x128xf32>
    %171 = vector.broadcast %cst_92 : f32 to vector<8x128xf32>
    %172 = arith.minimumf %171, %170 : vector<8x128xf32>
    %173 = arith.mulf %172, %163 : vector<8x128xf32>
    %cst_93 = arith.constant 1.000000e-03 : f32
    %174 = vector.broadcast %cst_93 : f32 to vector<8x128xf32>
    %175 = arith.mulf %173, %174 : vector<8x128xf32>
    %176 = arith.mulf %175, %6 : vector<8x128xf32>
    %177 = arith.addf %134, %176 : vector<8x128xf32>
    %cst_94 = arith.constant -3.000000e-01 : f32
    %cst_95 = arith.constant 3.000000e-01 : f32
    %178 = vector.broadcast %cst_94 : f32 to vector<8x128xf32>
    %179 = arith.maximumf %178, %177 : vector<8x128xf32>
    %180 = vector.broadcast %cst_95 : f32 to vector<8x128xf32>
    %181 = arith.minimumf %180, %179 : vector<8x128xf32>
    %c2_96 = arith.constant 2 : index
    %c0_97 = arith.constant 0 : index
    %c0_98 = arith.constant 0 : index
    %182 = vector.load %arg7[%c2_96, %c0_97, %c0_98] : memref<3x8x128xf32, #tpu.memory_space<vmem>>, vector<1x8x128xf32>
    %183 = vector.shape_cast %182 : vector<1x8x128xf32> to vector<8x128xf32>
    %184 = vector.shape_cast %181 : vector<8x128xf32> to vector<1x8x128xf32>
    tpu.vector_store %arg7[%c2_96, %c0_97, %c0_98], %184 {strides = array<i32>} : memref<3x8x128xf32, #tpu.memory_space<vmem>>, vector<1x8x128xf32>,
    return
  }
  func.func @transform_0(%arg0: i32) -> (i32, i32, i32) {
    %c0_i32 = arith.constant 0 : i32
    %c0_i32_0 = arith.constant 0 : i32
    %c0_i32_1 = arith.constant 0 : i32
    return %c0_i32, %arg0, %c0_i32_0 : i32, i32, i32
  }
  func.func @transform_1(%arg0: i32) -> (i32, i32, i32) {
    %c0_i32 = arith.constant 0 : i32
    %c0_i32_0 = arith.constant 0 : i32
    %c0_i32_1 = arith.constant 0 : i32
    return %c0_i32, %arg0, %c0_i32_0 : i32, i32, i32
  }
  func.func @transform_2(%arg0: i32) -> (i32, i32, i32) {
    %c0_i32 = arith.constant 0 : i32
    %c0_i32_0 = arith.constant 0 : i32
    %c0_i32_1 = arith.constant 0 : i32
    return %c0_i32, %arg0, %c0_i32_0 : i32, i32, i32
  }
  func.func @transform_3(%arg0: i32) -> (i32, i32, i32) {
    %c0_i32 = arith.constant 0 : i32
    %c0_i32_0 = arith.constant 0 : i32
    %c0_i32_1 = arith.constant 0 : i32
    return %c0_i32, %arg0, %c0_i32_0 : i32, i32, i32
  }
  func.func @transform_4(%arg0: i32) -> (i32, i32) {
    %c0_i32 = arith.constant 0 : i32
    %c0_i32_0 = arith.constant 0 : i32
    return %arg0, %c0_i32 : i32, i32
  }
  func.func @transform_5(%arg0: i32) -> (i32, i32, i32) {
    %c0_i32 = arith.constant 0 : i32
    %c0_i32_0 = arith.constant 0 : i32
    %c0_i32_1 = arith.constant 0 : i32
    return %c0_i32, %arg0, %c0_i32_0 : i32, i32, i32
  }
  func.func @transform_6(%arg0: i32) -> (i32, i32, i32) {
    %c0_i32 = arith.constant 0 : i32
    %c0_i32_0 = arith.constant 0 : i32
    %c0_i32_1 = arith.constant 0 : i32
    return %c0_i32, %arg0, %c0_i32_0 : i32, i32, i32
  }
}

</mosaic_0001>

<bundles_post_ra>
// kernel: tpu_custom_call.1
= control target key start
LH: loop header
LB: loop body
LE: loop exit
PB: predicated region body
PF: predicated region fallthrough
CT: control target
= control target key end

     0   :  { %12 = vsyncpa [#allocation3], 0  ;;  %s522_s0 = inlined_call_operand.vmem [shape: f32[3,8,128], index: 0, kind: input, shape index: {}]   ;;  %s523_s1 = inlined_call_operand.vmem [shape: f32[3,8,128], index: 1, kind: input, shape index: {}]   ;;  %s524_s2 = inlined_call_operand.hbm [shape: f32[3,8,128], index: 2, kind: input, shape index: {}]   ;;  %s525_s3 = inlined_call_operand.hbm [shape: f32[3,8,128], index: 3, kind: input, shape index: {}, may-alias: {3,6}]   ;;  %s526_s4 = inlined_call_operand.hbm [shape: s32[8,128], index: 4, kind: input, shape index: {}]   ;;  %s527_s5 = inlined_call_operand.hbm [shape: f32[3,8,128], index: 5, kind: output, shape index: {0}]   ;;  %s528_s6 = inlined_call_operand.hbm [shape: f32[3,8,128], index: 6, kind: output, shape index: {1}, may-alias: {3,6}]  }
   0x1   :  { %13 = vsyncpa [#allocation6], 0 }
   0x2   :  { %14 = vsyncpa [#allocation4], 0 }
   0x3   :  { %15 = vsyncpa [#allocation10], 0  ;;  %s349_s21 = smov [#allocation5]   ;;  %s350_s23 = smov [#allocation2]  }
   0x4   :  { %s37_s22 = sshll.u32 %s349_s21, 4  ;;  %s25_s24 = sshll.u32 %s350_s23, 4  ;;  %s38_s22 = int_to_ptr.vmem [resolvable:$true] %s37_s22  ;;  %s392_s24 = int_to_ptr.vmem [resolvable:$true] %s25_s24 }
   0x5   :  { %s231_s27 = scalar_lea.hbm %s525_s3, 384 }
   0x6   :  { %p232_p0 = scmp.ne.s32.totalorder %s525_s3, %s231_s27  ;;  %p235_p1 = scmp.lt.u32.totalorder %s231_s27, %s525_s3 }
   0x8   :  { %p237_p2 = pnand %p235_p1, %p232_p0 }
   0xa   :  { %240 = shalt.err (!%p237_p2)
}
   0xb   :  { %s241_s8 = scalar_lea.vmem %s38_s22, 384  ;;  %p246_p4 = scmp.lt.s32.totalorder %s38_s22, %s38_s22 }
   0xc   :  { %p242_p3 = scmp.ne.s32.totalorder %s38_s22, %s241_s8  ;;  %p247_p5 = scmp.lt.s32.totalorder %s241_s8, %s241_s8 }
   0xe   :  { %p248_p6 = por %p247_p5, %p246_p4 }
  0x10   :  { %p249_p7 = pnand %p248_p6, %p242_p3 }
  0x12   :  { %252 = shalt.err (!%p249_p7)
}
  0x13   :  { %s351_s9 = smov 128   ;;  %s352_s10 = smov 8  }
  0x14   :  { %43 = dma.hbm_to_vmem [thread:$0]  %s525_s3, 384, %s38_s22, [#allocation6], %s351_s9, %s351_s9, %s352_s10  }
  0x15   :  { %s253_s15 = scalar_lea.hbm %s524_s2, 384 }
  0x16   :  { %p254_p8 = scmp.ne.s32.totalorder %s524_s2, %s253_s15  ;;  %p257_p9 = scmp.lt.u32.totalorder %s253_s15, %s524_s2 }
  0x18   :  { %p259_p10 = pnand %p257_p9, %p254_p8 }
  0x1a   :  { %262 = shalt.err (!%p259_p10)
}
  0x1b   :  { %s263_s20 = scalar_lea.vmem %s392_s24, 384  ;;  %p268_p12 = scmp.lt.s32.totalorder %s392_s24, %s392_s24 }
  0x1c   :  { %p264_p11 = scmp.ne.s32.totalorder %s392_s24, %s263_s20  ;;  %p269_p13 = scmp.lt.s32.totalorder %s263_s20, %s263_s20 }
  0x1e   :  { %p270_p0 = por %p269_p13, %p268_p12 }
  0x20   :  { %p271_p1 = pnand %p270_p0, %p264_p11 }
  0x22   :  { %274 = shalt.err (!%p271_p1)
}
  0x23   :  { %31 = dma.hbm_to_vmem [thread:$0]  %s524_s2, 384, %s392_s24, [#allocation3], %s351_s9, %s351_s9, %s352_s10  }
  0x24   :  { %s353_s22 = smov [#allocation7]   ;;  %s275_s27 = scalar_lea.hbm %s526_s4, 128 }
  0x25   :  { %s50_s23 = sshll.u32 %s353_s22, 4  ;;  %p276_p2 = scmp.ne.s32.totalorder %s526_s4, %s275_s27  ;;  %s51_s23 = int_to_ptr.vmem [resolvable:$true] %s50_s23 }
  0x26   :  { %p279_p3 = scmp.lt.u32.totalorder %s275_s27, %s526_s4 }
  0x28   :  { %p281_p4 = pnand %p279_p3, %p276_p2 }
  0x2a   :  { %284 = shalt.err (!%p281_p4)
}
  0x2b   :  { %s285_s8 = scalar_lea.vmem %s51_s23, 128  ;;  %p290_p6 = scmp.lt.s32.totalorder %s51_s23, %s51_s23 }
  0x2c   :  { %p286_p5 = scmp.ne.s32.totalorder %s51_s23, %s285_s8  ;;  %p291_p7 = scmp.lt.s32.totalorder %s285_s8, %s285_s8 }
  0x2e   :  { %p292_p8 = por %p291_p7, %p290_p6 }
  0x30   :  { %p293_p9 = pnand %p292_p8, %p286_p5 }
  0x32   :  { %296 = shalt.err (!%p293_p9)
}
  0x33   :  { %53 = dma.hbm_to_vmem [thread:$0]  %s526_s4, 128, %s51_s23, [#allocation6]  }
  0x34   :  { %341 = dma.done.wait [#allocation3], 384  }
  0x35   :  { %342 = vsyncadd [#allocation3], 4294966912 }
  0x36   :  { %343 = dma.done.wait [#allocation6], 512  }
  0x37   :  { %344 = vsyncadd [#allocation6], 4294966784  ;;  %v68_v0 = vld [vmem:[%s522_s0] sm:$0xff]  ;;  %v447_v4 = vld [vmem:[#allocation7] sm:$0xff] }
  0x38   :  { %v69_v1 = vld [vmem:[%s523_s1] sm:$0xff]  ;;  %v215_v5 = vld [vmem:[%s522_s0 + $0x8] sm:$0xff]  ;;  %v452_v6 = vld [vmem:[#allocation5] sm:$0xff]  ;;  %v80_v8 = vand.u32 1, %v447_v4  ;;  %v82_v9 = vand.u32 8, %v447_v4  ;;  %v119_v14 = vand.u32 2, %v447_v4 }
  0x39   :  { %v71_v2 = vsub.f32 %v69_v1, %v68_v0  ;;  %v74_v3 = vld [vmem:[#allocation2] sm:$0xff]  ;;  %v216_v10 = vld [vmem:[%s523_s1 + $0x8] sm:$0xff]  ;;  %v219_v17 = vld [vmem:[%s522_s0 + $0x10] sm:$0xff]  ;;  %v121_v23 = vand.u32 16, %v447_v4  ;;  %v155_v28 = vand.u32 4, %v447_v4  ;;  %v157_v31 = vand.u32 32, %v447_v4 }
  0x3a   :  { %v75_v7 = vmul.f32 0.003, %v74_v3  ;;  %v108_v12 = vsub.f32 %v216_v10, %v215_v5  ;;  %v112_v13 = vld [vmem:[#allocation2 + $0x8] sm:$0xff]  ;;  %vm81_vm1 = vcmp.ne.s32.totalorder %v80_v8, 0  ;;  %vm460_vm2 = vcmp.ne.s32.totalorder %v82_v9, 0  ;;  %v464_v16 = vld [vmem:[#allocation5 + $0x8] sm:$0xff] }
  0x3b   :  { %v72_v11 = vmul.f32 0.15, %v71_v2  ;;  %vm84_vm0 = vcmp.gt.f32.partialorder %v71_v2, 0.0  ;;  %v113_v20 = vmul.f32 0.003, %v112_v13  ;;  %vm120_vm4 = vcmp.ne.s32.totalorder %v119_v14, 0 }
  0x3c   :  { %vm85_vm3 = vmand %vm81_vm1, %vm84_vm0  ;;  %v109_v19 = vmul.f32 0.15, %v108_v12  ;;  %v220_v21 = vld [vmem:[%s523_s1 + $0x10] sm:$0xff]  ;;  %vm123_vm5 = vcmp.gt.f32.partialorder %v108_v12, 0.0  ;;  %v475_v27 = vld [vmem:[#allocation5 + $0x10] sm:$0xff]  ;;  %vm122_vm9 = vcmp.ne.s32.totalorder %v121_v23, 0 }
  0x3d   :  { %v73_v18 = vadd.f32 %v72_v11, %v452_v6  ;;  %v86_v22 = vsel %vm85_vm3, 0.0, %v71_v2  ;;  %v148_v24 = vsub.f32 %v220_v21, %v219_v17  ;;  %vm124_vm7 = vmand %vm120_vm4, %vm123_vm5  ;;  %s354_s0 = smov [#allocation8]   ;;  %vm156_vm12 = vcmp.ne.s32.totalorder %v155_v28, 0 }
  0x3e   :  { %vm87_vm6 = vcmp.lt.f32.partialorder %v86_v22, 0.0  ;;  %v110_v26 = vadd.f32 %v109_v19, %v464_v16  ;;  %v125_v29 = vsel %vm124_vm7, 0.0, %v108_v12  ;;  %s183_s1 = sshll.u32 %s354_s0, 4  ;;  %vm158_vm14 = vcmp.ne.s32.totalorder %v157_v31, 0  ;;  %s184_s1 = int_to_ptr.vmem [resolvable:$true] %s183_s1 }
  0x3f   :  { %v76_v25 = vsub.f32 %v73_v18, %v75_v7  ;;  %vm88_vm8 = vmand %vm460_vm2, %vm87_vm6  ;;  %v149_v30 = vmul.f32 0.2, %v148_v24  ;;  %vm126_vm10 = vcmp.lt.f32.partialorder %v125_v29, 0.0  ;;  %vm159_vm13 = vcmp.gt.f32.partialorder %v148_v24, 0.0  ;;  %s297_s21 = scalar_lea.vmem %s184_s1, 384  ;;  %p302_p11 = scmp.lt.s32.totalorder %s184_s1, %s184_s1 }
  0x40   :  { %v89_v33 = vsel %vm88_vm8, 0.0, %v86_v22  ;;  %v114_v34 = vsub.f32 %v110_v26, %v113_v20  ;;  %vm127_vm11 = vmand %vm122_vm9, %vm126_vm10  ;;  %v64_v43 = vand.u32 64, %v447_v4  ;;  %p298_p10 = scmp.ne.s32.totalorder %s184_s1, %s297_s21  ;;  %p303_p12 = scmp.lt.s32.totalorder %s297_s21, %s297_s21 }
  0x41   :  { %v213_v32 = vclamps-f32 %v76_v25, 1.0  ;;  %v90_v35 = vmul.f32 %v89_v33, %v89_v33  ;;  %v150_v36 = vadd.f32 %v149_v30, %v475_v27  ;;  %v128_v38 = vsel %vm127_vm11, 0.0, %v125_v29  ;;  %vm160_vm15 = vmand %vm156_vm12, %vm159_vm13 }
  0x42   :  { %v217_v37 = vclamps-f32 %v114_v34, 1.0  ;;  %v129_v40 = vmul.f32 %v128_v38, %v128_v38  ;;  %v161_v42 = vsel %vm160_vm15, 0.0, %v148_v24  ;;  %p304_p13 = por %p303_p12, %p302_p11 }
  0x43   :  { %79 = vst [vmem:[#allocation8] sm:$0xff] %v213_v32  ;;  %v91_v39 = vmul.f32 0.02051754, %v90_v35  ;;  %v221_v41 = vclamps-f32 %v150_v36, 1.0  ;;  %vm162_vm0 = vcmp.lt.f32.partialorder %v161_v42, 0.0 }
  0x44   :  { %118 = vst [vmem:[#allocation8 + $0x8] sm:$0xff] %v217_v37  ;;  %v130_v45 = vmul.f32 0.02051754, %v129_v40  ;;  %vm483_vm1 = vmand %vm158_vm14, %vm162_vm0  ;;  %p305_p0 = pnand %p304_p13, %p298_p10 }
  0x45   :  { %v92_v44 = vsub.f32 1.0, %v91_v39  ;;  %154 = vst [vmem:[#allocation8 + $0x10] sm:$0xff] %v221_v41 }
  0x46   :  { %308 = shalt.err (!%p305_p0)
}
  0x47   :  { %s309_s25 = scalar_lea.hbm %s527_s5, 384 }
  0x48   :  { %p310_p1 = scmp.ne.s32.totalorder %s527_s5, %s309_s25  ;;  %p313_p2 = scmp.lt.u32.totalorder %s309_s25, %s527_s5 }
  0x4a   :  { %p315_p3 = pnand %p313_p2, %p310_p1 }
  0x4c   :  { %318 = shalt.err (!%p315_p3)
}
  0x4d   :  { %189 = dma.vmem_to_hbm [thread:$0]  %s184_s1, 384, %s527_s5, [#allocation4], %s351_s9, %s351_s9, %s352_s10   ;;  %v93_v47 = vmax.f32 %v92_v44, 0.0  ;;  %v131_v48 = vsub.f32 1.0, %v130_v45  ;;  %v164_v49 = vsel %vm483_vm1, 0.0, %v161_v42  ;;  %vm65_vm2 = vcmp.eq.s32.totalorder %v64_v43, 0 }
  0x4e   :  { %v165_v50 = vmul.f32 %v164_v49, %v164_v49  ;;  %v355_v56 = vmov 0.0   ;;  %s356_s5 = smov [#allocation9]  }
  0x4f   :  { %v94_v51 = vmin.f32 %v93_v47, 1.0  ;;  %v132_v52 = vmax.f32 %v131_v48, 0.0  ;;  %v212_v57 = vsel %vm65_vm2, 1.0, %v355_v56  ;;  %s195_s8 = sshll.u32 %s356_s5, 4  ;;  %s196_s8 = int_to_ptr.vmem [resolvable:$true] %s195_s8 }
  0x50   :  { %v166_v53 = vmul.f32 0.02051754, %v165_v50  ;;  %s319_s2 = scalar_lea.vmem %s196_s8, 384  ;;  %p324_p5 = scmp.lt.s32.totalorder %s196_s8, %s196_s8 }
  0x51   :  { %v95_v54 = vmul.f32 %v94_v51, %v89_v33  ;;  %v133_v55 = vmin.f32 %v132_v52, 1.0  ;;  %p320_p4 = scmp.ne.s32.totalorder %s196_s8, %s319_s2  ;;  %p325_p6 = scmp.lt.s32.totalorder %s319_s2, %s319_s2 }
  0x52   :  { %v167_v58 = vsub.f32 1.0, %v166_v53 }
  0x53   :  { %v96_v59 = vmul.f32 0.002, %v95_v54  ;;  %v134_v60 = vmul.f32 %v133_v55, %v128_v38  ;;  %p326_p7 = por %p325_p6, %p324_p5 }
  0x54   :  { %v168_v61 = vmax.f32 %v167_v58, 0.0 }
  0x55   :  { %v97_v62 = vmul.f32 %v212_v57, %v96_v59  ;;  %v135_v63 = vmul.f32 0.002, %v134_v60  ;;  %p327_p8 = pnand %p326_p7, %p320_p4 }
  0x56   :  { %v169_v0 = vmin.f32 %v168_v61, 1.0 }
  0x57   :  { %v98_v1 = vadd.f32 %v97_v62, %v452_v6  ;;  %v136_v2 = vmul.f32 %v212_v57, %v135_v63 }
  0x58   :  { %v170_v3 = vmul.f32 %v169_v0, %v164_v49 }
  0x59   :  { %v214_v4 = vclamps-f32 %v98_v1, 0.3  ;;  %v137_v5 = vadd.f32 %v136_v2, %v464_v16 }
  0x5a   :  { %v171_v7 = vmul.f32 0.001, %v170_v3 }
  0x5b   :  { %101 = vst [vmem:[#allocation9] sm:$0xff] %v214_v4  ;;  %v218_v8 = vclamps-f32 %v137_v5, 0.3 }
  0x5c   :  { %v172_v9 = vmul.f32 %v212_v57, %v171_v7 }
  0x5d   :  { %141 = vst [vmem:[#allocation9 + $0x8] sm:$0xff] %v218_v8 }
  0x5e   :  { %v173_v10 = vadd.f32 %v172_v9, %v475_v27 }
  0x60   :  { %v222_v11 = vclamps-f32 %v173_v10, 0.3 }
  0x62   :  { %177 = vst [vmem:[#allocation9 + $0x10] sm:$0xff] %v222_v11 }
  0x63   :  { %330 = shalt.err (!%p327_p8)
}
  0x64   :  { %s331_s12 = scalar_lea.hbm %s528_s6, 384 }
  0x65   :  { %p332_p9 = scmp.ne.s32.totalorder %s528_s6, %s331_s12  ;;  %p335_p10 = scmp.lt.u32.totalorder %s331_s12, %s528_s6 }
  0x67   :  { %p337_p11 = pnand %p335_p10, %p332_p9 }
  0x69   :  { %340 = shalt.err (!%p337_p11)
}
  0x6a   :  { %201 = dma.vmem_to_hbm [thread:$0]  %s196_s8, 384, %s528_s6, [#allocation10], %s351_s9, %s351_s9, %s352_s10  }
  0x6b   :  { %345 = dma.done.wait [#allocation4], 384  }
  0x6c   :  { %346 = vsyncadd [#allocation4], 4294966912 }
  0x6d   :  { %347 = dma.done.wait [#allocation10], 384  }
  0x6e   :  { %348 = vsyncadd [#allocation10], 4294966912 }
  0x6f   :  { %208 = vsyncpa [#allocation3], 1 }
  0x70   :  { %209 = vsyncpa [#allocation6], 1 }
  0x71   :  { %210 = vsyncpa [#allocation4], 1 }
  0x72   :  { %211 = vsyncpa [#allocation10], 1 }

</bundles_post_ra>
